<compile_context>
chip_gen: v6e
topology: v6e:2x2x1
jax: 0.10.0
libtpu: 0.0.40
codegen_flags: <defaults>
</compile_context>

<pallas_src>
import functools
import math

import jax
import jax.numpy as jnp
from jax.experimental import pallas as pl
from jax.experimental.pallas import tpu as pltpu


_VMEM_LIMIT = 32 * 1024 * 1024          # safe scoped-VMEM request on v5e/v6e/v7x
_FUSED_WS_BUDGET = 20 * 1024 * 1024     # working-set cap for the fused single-pass path
_TWO_PASS_WS_BUDGET = 12 * 1024 * 1024  # double-buffered block budget for the fallback


def _eca_kernel_size(c, b=1, gamma=2):
    t = int(abs((math.log(c, 2) + b) / gamma))
    return t if t % 2 else t + 1


def _round_up(x, m):
    return ((x + m - 1) // m) * m


def _choose_tiles(nc, hw, itemsize, ws_budget=_TWO_PASS_WS_BUDGET):
    # Elementwise pass holds 2 input + 2 output double-buffered (R, T) blocks in
    # the I/O dtype; size blocks by the REAL itemsize (bf16 -> 2x larger tiles).
    elems = max(ws_budget // (4 * itemsize), 8 * 128)
    t = min(_round_up(hw, 128), 8192)
    t = min(t, max(128, ((elems // 8) // 128) * 128))
    if t >= hw:                      # full lane extent -> no ragged lane tile
        t = hw
    r = max(8, (elems // max(t, 1)) // 8 * 8)
    if r >= nc:                      # full row extent (allowed even if nc % 8 != 0)
        r = nc
    return r, t


# ---------------- fused single-pass kernel (grid = (N,)) ------------------------
# band_ref: (C, C) f32 banded ECA conv matrix (built once in the wrapper)
# x_ref / o_ref: (1, C, HW) in the I/O dtype

def _fused_kernel(band_ref, x_ref, o_ref, *, hw):
    xf = x_ref[0].astype(jnp.float32)                               # (C, HW)
    mean = jnp.sum(xf, axis=-1, keepdims=True) * (1.0 / hw)         # (C, 1) f32
    y = jnp.dot(band_ref[...], mean, preferred_element_type=jnp.float32)  # (C, 1)
    gate_p1 = 1.0 / (1.0 + jnp.exp(-y)) + 1.0                       # sigmoid + residual
    o_ref[0] = jnp.maximum(xf * gate_p1, 0.0).astype(o_ref.dtype)


# ---------------- two-pass fallback: pass 1, masked spatial sum -----------------
# x_ref: (R, T) io dtype ; s_ref: (R, 1) f32, resident across the t axis

def _spatial_sum_kernel(x_ref, s_ref, *, hw, t_tile):
    t = pl.program_id(1)

    @pl.when(t == 0)
    def _():
        s_ref[...] = jnp.zeros_like(s_ref)

    xf = x_ref[...].astype(jnp.float32)
    lane = jax.lax.broadcasted_iota(jnp.int32, xf.shape, 1) + t * t_tile
    xf = jnp.where(lane < hw, xf, 0.0)          # mask ragged last HW tile
    s_ref[...] += jnp.sum(xf, axis=-1, keepdims=True)


# ---------------- two-pass fallback: pass 2, gated residual + relu --------------
# g_ref: (R, 1) f32 holding (gate + 1) ; x_ref / o_ref: (R, T) io dtype

def _scale_relu_kernel(g_ref, x_ref, o_ref):
    xf = x_ref[...].astype(jnp.float32)
    o_ref[...] = jnp.maximum(xf * g_ref[...], 0.0).astype(o_ref.dtype)


# ---------------- wrapper-side helpers ------------------------------------------

def _eca_band(w_k, c, pad):
    # band[i, j] = w[j - i + pad] if |j - i| <= pad else 0   (zero-padded conv1d)
    k = w_k.shape[0]
    ci = jnp.arange(c)[:, None]
    cj = jnp.arange(c)[None, :]
    idx = cj - ci + pad
    valid = (idx >= 0) & (idx < k)
    return jnp.where(valid, w_k[jnp.clip(idx, 0, k - 1)], 0.0).astype(jnp.float32)


def _eca_gate_plus_one(mean_nc, w_k):
    # Tiny O(N*C) work: channel-direction conv1d (zero padded, no bias) + sigmoid.
    k = w_k.shape[0]
    pad = k // 2
    c = mean_nc.shape[1]
    mp = jnp.pad(mean_nc, ((0, 0), (pad, pad)))
    y = sum(w_k[j] * mp[:, j:j + c] for j in range(k))
    return jax.nn.sigmoid(y) + 1.0


def basic_block_forward(x_nchw, conv1d_weight, *, force_two_pass=False,
                        tile_override=None):
    """x_nchw: (N, C, H, W) f32/bf16 ; conv1d_weight: (1, 1, k) (PyTorch shape)."""
    # TODO(synk): only the identity-shortcut path (stride=1, in_planes==planes) is
    # implemented; the conv1x1+BatchNorm downsample shortcut branch is not built.
    n, c, h, w = x_nchw.shape
    hw = h * w
    nc = n * c
    dtype = x_nchw.dtype
    itemsize = jnp.dtype(dtype).itemsize

    w_k = conv1d_weight.reshape(-1).astype(jnp.float32)
    pad = w_k.shape[0] // 2

    x3 = x_nchw.reshape(n, c, hw)
    cparams_fused = pltpu.CompilerParams(
        dimension_semantics=("parallel",), vmem_limit_bytes=_VMEM_LIMIT)
    cparams_reduce = pltpu.CompilerParams(
        dimension_semantics=("parallel", "arbitrary"), vmem_limit_bytes=_VMEM_LIMIT)
    cparams_ew = pltpu.CompilerParams(
        dimension_semantics=("parallel", "parallel"), vmem_limit_bytes=_VMEM_LIMIT)

    # ---- fused single-pass path: one HBM read + one HBM write of x ----
    fused_ws = (4 * c * hw * itemsize      # 2x in + 2x out double-buffered slabs
                + 2 * c * hw * 4           # f32 slab temporaries
                + 2 * c * c * 4)           # banded ECA matrix (double-buffered)
    if not force_two_pass and fused_ws <= _FUSED_WS_BUDGET:
        band = _eca_band(w_k, c, pad)                       # (C, C) f32, fetched once
        out3 = pl.pallas_call(
            functools.partial(_fused_kernel, hw=hw),
            out_shape=jax.ShapeDtypeStruct((n, c, hw), dtype),
            grid_spec=pltpu.PrefetchScalarGridSpec(
                num_scalar_prefetch=0,
                grid=(n,),
                in_specs=[pl.BlockSpec((c, c), lambda i: (0, 0)),
                          pl.BlockSpec((1, c, hw), lambda i: (i, 0, 0))],
                out_specs=pl.BlockSpec((1, c, hw), lambda i: (i, 0, 0)),
            ),
            compiler_params=cparams_fused,
        )(band, x3)
        return out3.reshape(n, c, h, w)

    # ---- two-pass fallback: flattened (N*C, HW), no padded copies ----
    x2 = x3.reshape(nc, hw)
    if tile_override is not None:
        r_t, t_t = tile_override
    else:
        r_t, t_t = _choose_tiles(nc, hw, itemsize)
    n_r = pl.cdiv(nc, r_t)
    n_t = pl.cdiv(hw, t_t)

    # pass 1: per-(n*c) spatial sums with f32 accumulation, masked ragged tile
    sums = pl.pallas_call(
        functools.partial(_spatial_sum_kernel, hw=hw, t_tile=t_t),
        out_shape=jax.ShapeDtypeStruct((nc, 1), jnp.float32),
        grid_spec=pltpu.PrefetchScalarGridSpec(
            num_scalar_prefetch=0,
            grid=(n_r, n_t),
            in_specs=[pl.BlockSpec((r_t, t_t), lambda r, t: (r, t))],
            out_specs=pl.BlockSpec((r_t, 1), lambda r, t: (r, 0)),
        ),
        compiler_params=cparams_reduce,
    )(x2)

    mean = sums.reshape(n, c) * (1.0 / hw)                  # true HW, f32
    gate_p1 = _eca_gate_plus_one(mean, w_k).reshape(nc, 1)  # (N*C, 1) f32

    # pass 2: out = relu(x * (gate + 1)), ragged boundary blocks masked by Pallas
    out2 = pl.pallas_call(
        _scale_relu_kernel,
        out_shape=jax.ShapeDtypeStruct((nc, hw), dtype),
        grid_spec=pltpu.PrefetchScalarGridSpec(
            num_scalar_prefetch=0,
            grid=(n_r, n_t),
            in_specs=[pl.BlockSpec((r_t, 1), lambda r, t: (r, 0)),
                      pl.BlockSpec((r_t, t_t), lambda r, t: (r, t))],
            out_specs=pl.BlockSpec((r_t, t_t), lambda r, t: (r, t)),
        ),
        compiler_params=cparams_ew,
    )(gate_p1, x2)

    return out2.reshape(n, c, h, w)


def basic_block_reference(x_nchw, conv1d_weight):
    """Pure-JAX reference matching the PyTorch forward (computed in f32)."""
    xf = x_nchw.astype(jnp.float32)
    m = jnp.mean(xf, axis=(2, 3))                           # (N, C)
    k = conv1d_weight.shape[-1]
    pad = k // 2
    w = conv1d_weight.reshape(-1).astype(jnp.float32)
    c = m.shape[1]
    mp = jnp.pad(m, ((0, 0), (pad, pad)))
    y = sum(w[j] * mp[:, j:j + c] for j in range(k))
    gate = jax.nn.sigmoid(y)[:, :, None, None]
    return jax.nn.relu(xf * gate + xf)


if __name__ == "__main__":
    N, C, H, W = 2, 16, 16, 16

    key = jax.random.PRNGKey(0)
    kx, kw, kx2 = jax.random.split(key, 3)
    x = jax.random.normal(kx, (N, C, H, W), dtype=jnp.float32)

    k = _eca_kernel_size(C)                                 # k = 3 for C = 16
    bound = 1.0 / math.sqrt(1 * k)                          # PyTorch Conv1d default init
    conv1d_weight = jax.random.uniform(kw, (1, 1, k), jnp.float32,
                                       minval=-bound, maxval=bound)

    # 1) fused single-pass path (f32 I/O)
    ref = basic_block_reference(x, conv1d_weight)
    out = jax.block_until_ready(basic_block_forward(x, conv1d_weight))
    assert out.shape == (N, C, H, W)
    assert jnp.allclose(out, ref, atol=1e-5, rtol=1e-5), "fused f32 mismatch"

    # 2) two-pass fallback with forced small tiles -> exercises ragged-tile masking
    x_r = jax.random.normal(kx2, (N, C, 10, 20), dtype=jnp.float32)   # HW = 200
    ref_r = basic_block_reference(x_r, conv1d_weight)
    out_r = jax.block_until_ready(
        basic_block_forward(x_r, conv1d_weight, force_two_pass=True,
                            tile_override=(16, 128)))
    assert jnp.allclose(out_r, ref_r, atol=1e-5, rtol=1e-5), "two-pass ragged mismatch"

    # 3) two-pass fallback with auto-chosen tiles
    out_r2 = jax.block_until_ready(
        basic_block_forward(x_r, conv1d_weight, force_two_pass=True))
    assert jnp.allclose(out_r2, ref_r, atol=1e-5, rtol=1e-5), "two-pass auto mismatch"

    # 4) bf16 I/O (halves HBM traffic; accumulation / gate math stays f32 in-kernel)
    x_bf16 = x.astype(jnp.bfloat16)
    ref_bf16 = basic_block_reference(x_bf16, conv1d_weight)
    out_bf16 = jax.block_until_ready(basic_block_forward(x_bf16, conv1d_weight))
    assert out_bf16.dtype == jnp.bfloat16
    assert jnp.allclose(out_bf16.astype(jnp.float32), ref_bf16,
                        atol=3e-2, rtol=3e-2), "fused bf16 mismatch"

    out_bf16_tp = jax.block_until_ready(
        basic_block_forward(x_bf16, conv1d_weight, force_two_pass=True,
                            tile_override=(16, 128)))
    assert jnp.allclose(out_bf16_tp.astype(jnp.float32), ref_bf16,
                        atol=3e-2, rtol=3e-2), "two-pass bf16 mismatch"

    print("KERNEL_OK")
</pallas_src>

<mosaic_0001>
module attributes {stable_mosaic.version = 11 : i64} {
  func.func @_fused_kernel(%arg0: i32, %arg1: memref<16x16xf32, #tpu.memory_space<vmem>>, %arg2: memref<1x16x256xf32, #tpu.memory_space<vmem>>, %arg3: memref<1x16x256xf32, #tpu.memory_space<vmem>>) attributes {dimension_semantics = [#tpu.dimension_semantics<parallel>], iteration_bounds = array<i64: 2>, scalar_prefetch = 0 : i64, scratch_operands = 0 : i64, tpu.core_type = #tpu.core_type<tc>, window_params = [{pipeline_mode = #tpu.pipeline_mode<synchronous>, transform_indices = @transform_0, window_bounds = array<i64: 16, 16>}, {transform_indices = @transform_1, window_bounds = array<i64: 1, 16, 256>}, {transform_indices = @transform_2, window_bounds = array<i64: 1, 16, 256>}]} {
    %c0 = arith.constant 0 : index
    %c0_0 = arith.constant 0 : index
    %c0_1 = arith.constant 0 : index
    %0 = vector.load %arg2[%c0, %c0_0, %c0_1] : memref<1x16x256xf32, #tpu.memory_space<vmem>>, vector<1x16x256xf32>
    %1 = vector.shape_cast %0 : vector<1x16x256xf32> to vector<16x256xf32>
    %cst = arith.constant dense<0.000000e+00> : vector<16xf32>
    %2 = vector.multi_reduction <add>, %1, %cst [1] : vector<16x256xf32> to vector<16xf32>
    %3 = vector.shape_cast %2 : vector<16xf32> to vector<16x1xf32>
    %cst_2 = arith.constant 3.906250e-03 : f32
    %4 = vector.broadcast %cst_2 : f32 to vector<16x1xf32>
    %5 = arith.mulf %3, %4 : vector<16x1xf32>
    %c0_3 = arith.constant 0 : index
    %c0_4 = arith.constant 0 : index
    %6 = vector.load %arg1[%c0_3, %c0_4] : memref<16x16xf32, #tpu.memory_space<vmem>>, vector<16x16xf32>
    %cst_5 = arith.constant dense<0.000000e+00> : vector<16x1xf32>
    %7 = tpu.matmul %6, %5, %cst_5 {dimension_numbers = #tpu.dot_dimension_numbers<[1], [0], [0], [1], [0, 0, 1, 1], [], []>} : vector<16x16xf32>, vector<16x1xf32>, vector<16x1xf32> -> vector<16x1xf32>
    %cst_6 = arith.constant 0.000000e+00 : f32
    %8 = vector.broadcast %cst_6 : f32 to vector<16x1xf32>
    %9 = arith.subf %8, %7 : vector<16x1xf32>
    %10 = math.exp %9 : vector<16x1xf32>
    %cst_7 = arith.constant 1.000000e+00 : f32
    %11 = vector.broadcast %cst_7 : f32 to vector<16x1xf32>
    %12 = arith.addf %11, %10 : vector<16x1xf32>
    %cst_8 = arith.constant 1.000000e+00 : f32
    %13 = vector.broadcast %cst_8 : f32 to vector<16x1xf32>
    %14 = arith.divf %13, %12 : vector<16x1xf32>
    %cst_9 = arith.constant 1.000000e+00 : f32
    %15 = vector.broadcast %cst_9 : f32 to vector<16x1xf32>
    %16 = arith.addf %14, %15 : vector<16x1xf32>
    %17 = vector.broadcast %16 : vector<16x1xf32> to vector<16x256xf32>
    %18 = arith.mulf %1, %17 : vector<16x256xf32>
    %cst_10 = arith.constant 0.000000e+00 : f32
    %19 = vector.broadcast %cst_10 : f32 to vector<16x256xf32>
    %20 = arith.maximumf %18, %19 : vector<16x256xf32>
    %c0_11 = arith.constant 0 : index
    %c0_12 = arith.constant 0 : index
    %c0_13 = arith.constant 0 : index
    %21 = vector.load %arg3[%c0_11, %c0_12, %c0_13] : memref<1x16x256xf32, #tpu.memory_space<vmem>>, vector<1x16x256xf32>
    %22 = vector.shape_cast %21 : vector<1x16x256xf32> to vector<16x256xf32>
    %23 = vector.shape_cast %20 : vector<16x256xf32> to vector<1x16x256xf32>
    tpu.vector_store %arg3[%c0_11, %c0_12, %c0_13], %23 {strides = array<i32>} : memref<1x16x256xf32, #tpu.memory_space<vmem>>, vector<1x16x256xf32>,
    return
  }
  func.func @transform_0(%arg0: i32) -> (i32, i32) {
    %c0_i32 = arith.constant 0 : i32
    %c0_i32_0 = arith.constant 0 : i32
    %c0_i32_1 = arith.constant 0 : i32
    return %c0_i32, %c0_i32_0 : i32, i32
  }
  func.func @transform_1(%arg0: i32) -> (i32, i32, i32) {
    %c0_i32 = arith.constant 0 : i32
    %c0_i32_0 = arith.constant 0 : i32
    %c0_i32_1 = arith.constant 0 : i32
    return %arg0, %c0_i32, %c0_i32_0 : i32, i32, i32
  }
  func.func @transform_2(%arg0: i32) -> (i32, i32, i32) {
    %c0_i32 = arith.constant 0 : i32
    %c0_i32_0 = arith.constant 0 : i32
    %c0_i32_1 = arith.constant 0 : i32
    return %arg0, %c0_i32, %c0_i32_0 : i32, i32, i32
  }
}

</mosaic_0001>

<bundles_post_ra>
// kernel: tpu_custom_call.1
= control target key start
LH: loop header
LB: loop body
LE: loop exit
PB: predicated region body
PF: predicated region fallthrough
CT: control target
= control target key end

     0   :  { %7 = vsyncpa [#allocation3], 0  ;;  %s843_s0 = inlined_call_operand.hbm [shape: f32[16,16], index: 0, kind: input, shape index: {}]   ;;  %s844_s1 = inlined_call_operand.hbm [shape: f32[2,16,256], index: 1, kind: input, shape index: {}]   ;;  %s845_s2 = inlined_call_operand.hbm [shape: f32[2,16,256], index: 2, kind: output, shape index: {}]  }
   0x1   :  { %8 = vsyncpa [#allocation6], 0 }
   0x2   :  { %10 = vsyncpa [#allocation6 + $0x1], 0 }
   0x3   :  { %11 = vsyncpa [#allocation4], 0 }
   0x4   :  { %13 = vsyncpa [#allocation4 + $0x1], 0  ;;  %s662_s9 = smov 0   ;;  %s664_s10 = smov 0  }
   0x5   :  { %s666_s11 = smov 0   ;;  %s668_s12 = smov 0  }
   0x6 LB: > { %s683_s13 = sadd.s32 4294967295, %s635_s12   ;;  %s408_s14 = sadd.s32 4294967294, %s635_s12   ;;  %s635_s12 = sphi %s668_s12, %s867_s12   ;;  %s631_s11 = sphi %s666_s11, %s866_s11   ;;  %s627_s10 = sphi %s664_s10, %s865_s10   ;;  %s623_s9 = sphi %s662_s9, %s864_s9  }
   0x7   : > { %p60_p0 = scmp.ne.s32.totalorder %s627_s10, %s623_s9  ;;  %p846_p1 = scmp.eq.s32.totalorder %s683_s13, 0 }
   0x8   : > { %p90_p3 = scmp.eq.s32.totalorder %s408_s14, 1  ;;  %p409_p5 = scmp.ge.s32.totalorder %s635_s12, 1 }
   0x9   : > { %p692_p4 = por %p846_p1, %p60_p0  ;;  %p97_p7 = scmp.lt.s32.totalorder %s635_s12, 3 }
   0xa   : > { %p697_p6 = por %p90_p3, %p60_p0  ;;  %s637_s18 = smov [#allocation2]  }
   0xb   : > { %s850_s15 = scalar_select %p692_p4, 1, 0 }
   0xc   : > { %s851_s16 = scalar_select %p697_p6, 1, 0 }
   0xd   : > { %p702_p8 = pnand %p409_p5, %p97_p7  ;;  %s109_s19 = sshll.u32 %s637_s18, 4  ;;  %s110_s19 = int_to_ptr.vmem [resolvable:$true] %s109_s19 }
   0xe   : > { %s716_s21 = sadd.s32 1, %s635_s12   ;;  %s47_s22 = sadd.s32 1, %s631_s11 }
   0xf   : > { %s852_s17 = scalar_select %p702_p8, 1, 0 }
  0x10   : > { %p447_p9 = pneg %p702_p8  ;;  %s44_s23 = ssub.s32 %s635_s12, %s716_s21 }
  0x11   : > { %s524_s24 = scalar_lea.vmem %s110_s19, 256  ;;  %p532_p5 = scmp.lt.s32.totalorder %s110_s19, %s110_s19 }
  0x12   : > { %p711_p11 = pnand %p447_p9, %p846_p1  ;;  %p525_p13 = scmp.ne.s32.totalorder %s110_s19, %s524_s24 }
  0x13   : > { %p533_p7 = scmp.lt.s32.totalorder %s524_s24, %s524_s24 }
  0x14   : > { %p515_p12 = pneg %p711_p11 }
  0x15   : > { %p534_p10 = por %p533_p7, %p532_p5 }
  0x16   : > { %p527_p0 = pnand %p525_p13, %p515_p12 }
  0x18   : > { %p528_p3 = pneg %p527_p0 }
  0x1a   : > { %p535_p2 = pnand %p534_p10, %p528_p3 }
  0x1c   : > { %538 = shalt.err (!%p535_p2)
}
  0x1d   : > { %s638_s25 = smov 128   ;;  %s639_s26 = smov 8  }
  0x1e   : > { %450 = dma.hbm_to_vmem [thread:$0]  (!%p711_p11), %s843_s0, 256, %s110_s19, [#allocation3], %s638_s25, %s638_s25, %s639_s26  }
  0x1f   : > { %p45_p9 = scmp.eq.s32.totalorder %s44_s23, 0  ;;  %p54_p12 = scmp.ne.s32.totalorder %s631_s11, %s627_s10 }
  0x20   : > { %p55_p10 = scmp.eq.s32.totalorder %s635_s12, 0  ;;  %p460_p2 = scmp.lt.s32.totalorder %s635_s12, 2 }
  0x21   : > { %s733_s29 = scalar_select %p45_p9, %s631_s11, %s47_s22  }
  0x22   : > { %p56_p13 = por %p55_p10, %p54_p12  ;;  %p854_p0 = scmp.eq.s32.totalorder %s683_s13, 1 }
  0x23   : > { %s123_s3 = sand.u32 1, %s631_s11   ;;  %s426_s4 = sshll.u32 %s635_s12, 9 }
  0x24   : > { %p737_p3 = por %p854_p0, %p54_p12  ;;  %s412_s5 = sshll.u32 %s123_s3, 5 }
  0x25   : > { %s746_s8 = scalar_lea.hbm %s844_s1, %s426_s4  ;;  %s127_s14 = scalar_lea.vmem [#allocation5], %s412_s5 }
  0x26   : > { %s855_s30 = scalar_select %p737_p3, 1, 0 }
  0x27   : > { %s134_s18 = sshll.u32 %s127_s14, 4  ;;  %p748_p11 = pnand %p460_p2, %p56_p13  ;;  %s752_s18 = int_to_ptr.vmem [resolvable:$true] %s134_s18 }
  0x28   : > { %s754_s20 = scalar_lea.sflag [#allocation6], %s123_s3  ;;  %s539_s22 = scalar_lea.hbm %s746_s8, 512 }
  0x29   : > { %p540_p5 = scmp.ne.s32.totalorder %s746_s8, %s539_s22  ;;  %p541_p7 = pneg %p748_p11 }
  0x2a   : > { %s544_s25 = scalar_lea.hbm %s844_s1, 1024  ;;  %p545_p10 = scmp.lt.s32.totalorder %s746_s8, %s844_s1 }
  0x2b   : > { %p542_p9 = pnand %p541_p7, %p540_p5  ;;  %p546_p2 = scmp.lt.s32.totalorder %s544_s25, %s539_s22 }
  0x2d   : > { %p543_p12 = pneg %p542_p9  ;;  %p547_p13 = por %p546_p2, %p545_p10 }
  0x2f   : > { %p548_p0 = pnand %p547_p13, %p543_p12 }
  0x31   : > { %551 = shalt.err (!%p548_p0)
}
  0x32   : > { %s552_s28 = scalar_lea.vmem %s752_s18, 512  ;;  %s640_s3 = smov [#allocation5]  }
  0x33   : > { %p553_p1 = scmp.ne.s32.totalorder %s752_s18, %s552_s28  ;;  %s557_s4 = sshll.u32 %s640_s3, 4  ;;  %s558_s4 = int_to_ptr.vmem [resolvable:$false] %s557_s4 }
  0x34   : > { %s559_s5 = scalar_lea.vmem %s558_s4, 1024  ;;  %p560_p9 = scmp.lt.s32.totalorder %s752_s18, %s558_s4 }
  0x35   : > { %p555_p6 = pnand %p553_p1, %p541_p7  ;;  %p561_p3 = scmp.lt.s32.totalorder %s559_s5, %s552_s28 }
  0x37   : > { %p556_p5 = pneg %p555_p6  ;;  %p562_p4 = por %p561_p3, %p560_p9 }
  0x39   : > { %p563_p8 = pnand %p562_p4, %p556_p5 }
  0x3b   : > { %566 = shalt.err (!%p563_p8)
}
  0x3c   : > { %s641_s6 = smov 256   ;;  %s642_s7 = smov 16  }
  0x3d   : > { %454 = dma.hbm_to_vmem [thread:$0]  (!%p748_p11), %s746_s8, 512, %s752_s18, %s754_s20, %s641_s6, %s641_s6, %s642_s7  }
  0x3e   : > { %p857_p1 = scmp.ne.s32.totalorder %s852_s17, 0 }
  0x3f   : > { %p858_p6 = scmp.eq.s32.totalorder (!%p857_p1), %s683_s13, 0 }
  0x40   : > { %146 = sbr.rel (%p857_p1) target bundleno = 600 (0x258), region = 28 }
  0x45   : > { %610 = dma.done.wait (%p858_p6), [#allocation3], 256   ;;  %p859_p7 = pmov %p858_p6 }
  0x46   : > { %s782_s14 = sand.u32 1, %s627_s10   ;;  %p860_p4 = scmp.ne.s32.totalorder %s850_s15, 0 }
  0x47   : > { %612 = vsyncadd (%p859_p7), [#allocation3], 4294967040  ;;  %s417_s22 = sshll.u32 %s782_s14, 5  ;;  %s153_s23 = scalar_lea.sflag [#allocation6], %s782_s14 }
  0x48   : > { %s156_s8 = scalar_lea.vmem [#allocation5], %s417_s22 }
  0x49   : > { %614 = dma.done.wait (%p860_p4), %s153_s23, 512  }
  0x4a   : > { %616 = vsyncadd (%p860_p4), %s153_s23, 4294966784  ;;  %v179_v0 = vld [vmem:[%s156_s8 + $0x10] sm:$0xff]  ;;  %v180_v1 = vld [vmem:[%s156_s8 + $0x18] sm:$0xff]  ;;  %vm191_vm0 = vcmask 130048   ;;  %v643_v12 = vmov 0   ;;  %s176_s15 = scalar_lea.vmem [#allocation7], %s417_s22 }
  0x4b   : > { %v177_v2 = vld [vmem:[%s156_s8] sm:$0xff]  ;;  %v184_v3 = vadd.f32 %v180_v1, %v179_v0  ;;  %v178_v4 = vld [vmem:[%s156_s8 + $0x8] sm:$0xff]  ;;  %v189_v6 = vld [vmem:[#allocation2] sm:$0xff]  ;;  %503 = vset.pattern.permute.xlu1 %v643_v12  ;;  %504 = vset.pattern.permute.xlu0 %v643_v12  ;;  %s323_s17 = sshll.u32 %s176_s15, 4  ;;  %s427_s18 = sshll.u32 %s683_s13, 9  ;;  %s795_s17 = int_to_ptr.vmem [resolvable:$true] %s323_s17 }
  0x4c   : > { %v181_v5 = vadd.f32 %v178_v4, %v177_v2  ;;  %436 = vmatprep.mubr.msk.f32.mxu0 %vm191_vm0, %v189_v6  ;;  %v190_v11 = vld [vmem:[#allocation2 + $0x8] sm:$0xff]  ;;  %s800_s24 = scalar_lea.hbm %s845_s2, %s427_s18  ;;  %s310_s13 = scalar_lea.sflag [#allocation4], %s782_s14 }
  0x4d   : > { %185 = vadd.xlane.f32.xlu0 %v184_v3  ;;  %s567_s25 = scalar_lea.vmem %s795_s17, 512  ;;  %p861_p3 = scmp.ne.s32.totalorder %s855_s30, 0 }
  0x4e   : > { %p568_p8 = scmp.ne.s32.totalorder %s795_s17, %s567_s25  ;;  %s644_s26 = smov [#allocation7]  }
  0x4f   : > { %s571_s27 = sshll.u32 %s644_s26, 4  ;;  %s572_s27 = int_to_ptr.vmem [resolvable:$false] %s571_s27 }
  0x50   : > { %p569_p11 = pnand %p568_p8, %p861_p3  ;;  %s573_s28 = scalar_lea.vmem %s572_s27, 1024 }
  0x51   : > { %182 = vadd.xlane.f32.xlu0 %v181_v5  ;;  %p574_p10 = scmp.lt.s32.totalorder %s795_s17, %s572_s27  ;;  %p575_p2 = scmp.lt.s32.totalorder %s573_s28, %s567_s25 }
  0x52   : > { %p570_p12 = pneg %p569_p11 }
  0x53   : > { %p576_p13 = por %p575_p2, %p574_p10 }
  0x55   : > { %p577_p0 = pnand %p576_p13, %p570_p12 }
  0xd6   : > { %v186_v7 = vpop.xlane.xlu0 %185 }
  0xd7   : > { %v188_v8 = vmul.f32 0.00390625, %v186_v7 }
  0xd9   : > { %432 = vmatprep.subr.mxu0 %v188_v8 }
  0xda   : > { %433 = vmatpush3.msra.mxu0 %v188_v8  ;;  %v183_v9 = vpop.xlane.xlu0 %182 }
  0xdb   : > { %v187_v10 = vmul.f32 0.00390625, %v183_v9 }
  0xdd   : > { %434 = vmatprep.subr.mxu0 %v187_v10 }
  0xde   : > { %435 = vmatpush3.msra.mxu0 %v187_v10 }
  0xdf   : > { %437 = vmatmul.mubr.msk.f32.vlgmr.msra.gmra.mxu0 %vm191_vm0, %v190_v11 }
 0x19f   : > { %v438_v13 = vpop.f32.mrf.mxu0 }
 0x1a0   : > { %v274_v14 = vsub.f32 0.0, %v438_v13 }
 0x1a1   : > { %v264_v15 = vpop.f32.mrf.mxu0 }
 0x1a2   : > { %v277_v16 = vmul.f32 1.442695, %v274_v14  ;;  %v273_v17 = vsub.f32 0.0, %v264_v15 }
 0x1a4   : > { %505 = vpow2.f32 %v277_v16  ;;  %v275_v18 = vmul.f32 1.442695, %v273_v17 }
 0x1a6   : > { %507 = vpow2.f32 %v275_v18 }
 0x1b1   : > { %v506_v19 = vpop.eup %505 }
 0x1b2   : > { %v280_v21 = vadd.f32 1.0, %v506_v19 }
 0x1b3   : > { %v508_v20 = vpop.eup %507 }
 0x1b4   : > { %v279_v22 = vadd.f32 1.0, %v508_v20 }
 0x1b6   : > { %509 = vrcp.f32 %v279_v22 }
 0x1b7   : > { %511 = vrcp.f32 %v280_v21 }
 0x1c3   : > { %v510_v23 = vpop.eup %509 }
 0x1c4   : > { %v285_v24 = vadd.f32 1.0, %v510_v23  ;;  %v512_v25 = vpop.eup %511 }
 0x1c5   : > { %v286_v26 = vadd.f32 1.0, %v512_v25 }
 0x1c6   : > { %289 = vperm.xlu1 %503, %v285_v24  }
 0x1ca   : > { %294 = vperm.xlu1 %503, %v286_v26  }
 0x241   : > { %v290_v27 = vpop.permute.xlu1 %289 }
 0x242   : > { %v297_v28 = vmul.f32 %v290_v27, %v177_v2  ;;  %v298_v29 = vmul.f32 %v290_v27, %v178_v4 }
 0x244   : > { %v301_v30 = vmax.f32 %v297_v28, 0.0  ;;  %v302_v31 = vmax.f32 %v298_v29, 0.0 }
 0x245   : > { %v295_v32 = vpop.permute.xlu1 %294 }
 0x246   : > { %305 = vst [vmem:[%s176_s15] sm:$0xff] %v301_v30  ;;  %306 = vst [vmem:[%s176_s15 + $0x8] sm:$0xff] %v302_v31  ;;  %v299_v33 = vmul.f32 %v295_v32, %v179_v0  ;;  %v300_v34 = vmul.f32 %v295_v32, %v180_v1 }
 0x248   : > { %v303_v35 = vmax.f32 %v299_v33, 0.0  ;;  %v304_v36 = vmax.f32 %v300_v34, 0.0 }
 0x24a   : > { %307 = vst [vmem:[%s176_s15 + $0x10] sm:$0xff] %v303_v35  ;;  %308 = vst [vmem:[%s176_s15 + $0x18] sm:$0xff] %v304_v36 }
 0x24b   : > { %580 = shalt.err (!%p577_p0)
}
 0x24c   : > { %s581_s3 = scalar_lea.hbm %s800_s24, 512  ;;  %s585_s6 = scalar_lea.hbm %s845_s2, 1024 }
 0x24d   : > { %p582_p5 = scmp.ne.s32.totalorder %s800_s24, %s581_s3  ;;  %p586_p6 = scmp.lt.s32.totalorder %s800_s24, %s845_s2 }
 0x24e   : > { %p587_p7 = scmp.lt.s32.totalorder %s585_s6, %s581_s3 }
 0x24f   : > { %p583_p9 = pnand %p582_p5, %p861_p3 }
 0x250   : > { %p588_p4 = por %p587_p7, %p586_p6 }
 0x251   : > { %p584_p1 = pneg %p583_p9 }
 0x253   : > { %p589_p8 = pnand %p588_p4, %p584_p1 }
 0x255   : > { %592 = shalt.err (!%p589_p8)
}
 0x256   : > { %s645_s23 = smov 256   ;;  %s646_s8 = smov 16  }
 0x257   : > { %445 = dma.vmem_to_hbm [thread:$0]  (%p861_p3), %s795_s17, 512, %s800_s24, %s310_s13, %s645_s23, %s645_s23, %s646_s8  }
 0x258 PF: > { %s338_s15 = sand.u32 1, %s623_s9   ;;  %p862_p11 = scmp.ne.s32.totalorder %s851_s16, 0 }
 0x259   : > { %p863_p12 = scmp.ge.s32.totalorder %s635_s12, 2  ;;  %s339_s18 = scalar_lea.sflag [#allocation4], %s338_s15 }
 0x25b   : > { %p456_p10 = pnand %p863_p12, %p862_p11 }
 0x25d   : > { %p457_p2 = pneg %p456_p10 }
 0x25f   : > { %618 = dma.done.wait (%p457_p2), %s339_s18, 512  }
 0x260   : > { %620 = vsyncadd (%p457_p2), %s339_s18, 4294966784  ;;  %p16_p13 = scmp.ge.s32.totalorder %s716_s21, 4   ;;  %s864_s9 = smov %s627_s10 }
 0x261   : > { %s865_s10 = smov %s631_s11  ;;  %s866_s11 = smov %s733_s29 }
 0x262   : > { %s867_s12 = smov %s716_s21  ;;  %18 = sbr.rel (!%p16_p13) target bundleno = 6 (0x6), region = 78 }
 0x267   :  { %344 = vsyncpa [#allocation3], 1 }
 0x268   :  { %346 = vsyncpa [#allocation3 + $0x1], 1 }
 0x269   :  { %347 = vsyncpa [#allocation6], 1 }
 0x26a   :  { %349 = vsyncpa [#allocation6 + $0x1], 1 }
 0x26b   :  { %350 = vsyncpa [#allocation4], 1 }
 0x26c   :  { %352 = vsyncpa [#allocation4 + $0x1], 1 }

</bundles_post_ra>
